<compile_context>
chip_gen: v5e
topology: v5e:2x2
jax: 0.10.0
libtpu: 0.0.40
codegen_flags: <defaults>
</compile_context>

<pallas_src>
from functools import partial

import numpy as np
import jax
import jax.numpy as jnp
from jax import lax
from jax.experimental import pallas as pl
from jax.experimental.pallas import tpu as pltpu


def _pcilt_kernel(s_ref, wsum_ref, bias_ref, out_ref, *,
                  K, stride, TOH, OW, TIN, flat_out):
    """One (batch, output-row-tile) grid step.

    s_ref    : (1, Hp_full, Wp) VMEM block — channel-summed quantized activations,
               indexed by batch only (stays VMEM-resident across row tiles).
    wsum_ref : (O,) SMEM  — weight summed over (in, kh, kw) per output channel.
    bias_ref : (O,) SMEM
    out_ref  : (1, O, TOH, OW) VMEM block, or (1, O, TOH*OW) when flat_out.
    """
    t = pl.program_id(1)
    row0 = pl.multiple_of(t * (TOH * stride), TOH * stride)

    # Channel-summed, already-quantized rows for this output-row tile (integer f32).
    s = s_ref[0, pl.ds(row0, TIN), :]                       # (TIN, Wp)

    if stride == 1:
        # Separable KxK box sum: K sublane-shifted adds, then K lane-shifted adds.
        rowsum = s[0:TOH, :]
        for kh in range(1, K):
            rowsum = rowsum + s[kh:kh + TOH, :]
        acc = rowsum[:, 0:OW]
        for kw in range(1, K):
            acc = acc + rowsum[:, kw:kw + OW]
    else:
        # Dense row sum over kh, a single sublane-strided row subsample, then K
        # lane-strided column slices (K instead of K*K strided slices).
        HD = (TOH - 1) * stride + 1
        rowsum = s[0:HD, :]
        for kh in range(1, K):
            rowsum = rowsum + s[kh:kh + HD, :]
        rowsum = rowsum[::stride, :]                        # (TOH, Wp)
        span = (OW - 1) * stride + 1
        acc = rowsum[:, 0:span:stride]
        for kw in range(1, K):
            acc = acc + rowsum[:, kw:kw + span:stride]
        # TODO(synk): fold the column subsample into a single reshape/pick once the
        # Mosaic relayout for it is validated (removes the K lane-strided slices).

    if flat_out:
        # Lane-dense store path: pack the whole (TOH, OW) tile onto the lane axis so
        # every per-o store is an unmasked, lane-dense vst (OW < 128 case).
        acc = acc.reshape(TOH * OW)

    O = out_ref.shape[1]
    out_dtype = out_ref.dtype

    def scale_store(o, carry):
        # Dynamic SMEM scalar reads + dynamic leading-dim store keep live ranges flat
        # for large O (vs. a statically unrolled Python loop).
        out_ref[0, o] = (acc * wsum_ref[o] + bias_ref[o]).astype(out_dtype)
        return carry

    lax.fori_loop(0, O, scale_store, 0, unroll=min(O, 8))


def pcilt_conv2d(x, weight, bias, *, stride=1, padding=0, row_tile=None,
                 out_dtype=jnp.float32, lane_dense_out=False):
    """x: (B, C, H, W); weight: (O, C, K, K); bias: (O,). Returns (B, O, OH, OW)."""
    B, C, H, W = x.shape
    O, Ci, K, K2 = weight.shape
    assert Ci == C and K == K2
    # Window sums stay exact integers in f32 as long as 255*C*K*K < 2^24.
    assert 255.0 * C * K * K < 2.0 ** 24, "channel*window sum loses f32 integer exactness"

    # --- Hoisted pre-pass (plain XLA, fused): quantize like torch (round half-to-even,
    # clamp to [0,255]) and sum over channels.  Zero padding commutes with it.
    xq = jnp.clip(jnp.round(x.astype(jnp.float32) * 255.0), 0.0, 255.0)
    s = jnp.sum(xq, axis=1)                                   # (B, H, W), integer f32
    if padding > 0:
        s = jnp.pad(s, ((0, 0), (padding, padding), (padding, padding)))
    Hp, Wp = H + 2 * padding, W + 2 * padding
    OH = (Hp - K) // stride + 1
    OW = (Wp - K) // stride + 1

    # The PCILT table summed over (in, kh, kw, lut-entry) collapses to one scalar/chan.
    wsum = jnp.sum(weight.astype(jnp.float32), axis=(1, 2, 3))   # (O,)
    bias = bias.astype(jnp.float32)                              # (O,)

    # --- Per-generation VMEM budget and output-row tile size --------------------
    try:
        vmem_cap = int(pltpu.get_tpu_info().vmem_capacity_bytes)  # 64 MiB v7x, 128 MiB v5e/v6e
    except Exception:
        vmem_cap = 64 * 2 ** 20
    budget = (3 * vmem_cap) // 4                                  # headroom for compiler scratch

    out_elt = jnp.dtype(out_dtype).itemsize
    out_row_bytes = 2 * O * OW * out_elt                          # double-buffered output block
    if row_tile is not None:
        TOH = int(row_tile)
    else:
        in_bytes = 2 * Hp * Wp * 4                                # batch-resident input slab
        avail = max(budget - in_bytes - (2 << 20), out_row_bytes)
        TOH = int(min(avail // out_row_bytes, OH, 512))
        TOH = max((TOH // 8) * 8, min(8, OH))                     # sublane-aligned when tiled
    if TOH >= OH:
        TOH = OH                                                  # single tile = full dim
    T = -(-OH // TOH)                                             # cdiv
    OH_pad = T * TOH
    TIN = (TOH - 1) * stride + K

    # Pad input rows so the last (padded) row tile has a full input window; extra
    # output rows are sliced off below.
    need = (OH_pad - 1) * stride + K
    if need > Hp:
        s = jnp.pad(s, ((0, 0), (0, need - Hp), (0, 0)))
    Hp_full = s.shape[1]

    # Opt-in lane-dense output layout (store-path lever when OW < 128).
    flat_out = bool(lane_dense_out) and (TOH * OW) % 128 == 0
    # TODO(synk): enable flat_out by default once the in-kernel (TOH,OW)->(TOH*OW,)
    # sublane->lane reshape is validated on Mosaic.
    if flat_out:
        out_shape = jax.ShapeDtypeStruct((B, O, OH_pad * OW), out_dtype)
        out_spec = pl.BlockSpec((1, O, TOH * OW), lambda b, t: (b, 0, t))
    else:
        out_shape = jax.ShapeDtypeStruct((B, O, OH_pad, OW), out_dtype)
        out_spec = pl.BlockSpec((1, O, TOH, OW), lambda b, t: (b, 0, t, 0))

    in_block = Hp_full * Wp * 4
    out_block = O * TOH * OW * out_elt
    vmem_limit = int(min(max(2 * in_block + 2 * out_block + (4 << 20), 16 << 20), budget))

    cost = pl.CostEstimate(
        flops=int(B * OH * OW * (2 * K + 2 * O)),
        transcendentals=0,
        bytes_accessed=int(B * Hp_full * Wp * 4 + B * O * OH_pad * OW * out_elt + O * 8),
    )

    kernel = partial(_pcilt_kernel, K=K, stride=stride, TOH=TOH, OW=OW, TIN=TIN,
                     flat_out=flat_out)

    out = pl.pallas_call(
        kernel,
        out_shape=out_shape,
        grid=(B, T),
        in_specs=[
            # Channel-summed activations, indexed by batch only -> block stays
            # VMEM-resident across the row-tile axis (re-DMA only on batch change).
            pl.BlockSpec((1, Hp_full, Wp), lambda b, t: (b, 0, 0)),
            # Per-out-channel weight sum and bias as SMEM scalars.
            pl.BlockSpec(memory_space=pltpu.MemorySpace.SMEM),
            pl.BlockSpec(memory_space=pltpu.MemorySpace.SMEM),
        ],
        out_specs=out_spec,
        compiler_params=pltpu.CompilerParams(
            # Keep a v7x megacore split on batch when B >= 2 so both cores don't each
            # re-DMA the same batch-resident input slab; single-batch falls back to
            # splitting row tiles.
            dimension_semantics=("parallel", "arbitrary" if B >= 2 else "parallel"),
            vmem_limit_bytes=vmem_limit,
        ),
        cost_estimate=cost,
    )(s, wsum, bias)

    if flat_out:
        out = out.reshape(B, O, OH_pad, OW)
    if OH_pad != OH:
        out = out[:, :, :OH, :]
    return out


def _reference_pcilt(x, weight, bias, stride, padding):
    """Literal numpy re-implementation of the PyTorch forward (LUT lookup + sum)."""
    x = np.asarray(x, np.float32)
    weight = np.asarray(weight, np.float32)
    bias = np.asarray(bias, np.float32)
    O, C, K, _ = weight.shape
    pcilt = weight[..., None] * np.arange(256, dtype=np.float32)  # (O,C,K,K,256)
    xq = np.clip(np.round(x * 255.0), 0, 255).astype(np.int64)
    xq = np.pad(xq, ((0, 0), (0, 0), (padding, padding), (padding, padding)))
    B, _, Hp, Wp = xq.shape
    OH = (Hp - K) // stride + 1
    OW = (Wp - K) // stride + 1
    out = np.zeros((B, O, OH, OW), np.float32)
    for b in range(B):
        for i in range(0, Hp - K + 1, stride):
            for j in range(0, Wp - K + 1, stride):
                patch_idx = xq[b, :, i:i + K, j:j + K].reshape(-1)
                vals = pcilt[:, :, :, :, patch_idx]           # (O,C,K,K,N)
                out[b, :, i // stride, j // stride] = vals.sum(axis=(1, 2, 3, 4))
    return out + bias.reshape(1, -1, 1, 1)


if __name__ == "__main__":
    key = jax.random.PRNGKey(0)
    kx, kw = jax.random.split(key)

    B, C, H, W = 2, 4, 16, 16
    O, K = 8, 3
    stride, padding = 1, 1

    x = jax.random.uniform(kx, (B, C, H, W), dtype=jnp.float32)      # activations in [0,1)
    weight = jax.random.normal(kw, (O, C, K, K), dtype=jnp.float32)  # ~ torch.randn
    bias = jnp.zeros((O,), jnp.float32)                              # torch.zeros

    ref = _reference_pcilt(x, weight, bias, stride, padding)

    # Multi-tile path: explicit row_tile=8 -> grid=(B, 2).
    out = jax.block_until_ready(
        pcilt_conv2d(x, weight, bias, stride=stride, padding=padding, row_tile=8))
    np.testing.assert_allclose(np.asarray(out), ref, rtol=2e-4, atol=2e-3)

    # VMEM-budget-derived row tile (single tile at this size).
    out2 = jax.block_until_ready(
        pcilt_conv2d(x, weight, bias, stride=stride, padding=padding))
    np.testing.assert_allclose(np.asarray(out2), ref, rtol=2e-4, atol=2e-3)

    print("KERNEL_OK")
</pallas_src>

<mosaic_0001>
module attributes {stable_mosaic.version = 11 : i64} {
  func.func @_pcilt_kernel(%arg0: i32, %arg1: i32, %arg2: memref<1x18x18xf32, #tpu.memory_space<vmem>>, %arg3: memref<8xf32, #tpu.memory_space<smem>>, %arg4: memref<8xf32, #tpu.memory_space<smem>>, %arg5: memref<1x8x8x16xf32, #tpu.memory_space<vmem>>) attributes {dimension_semantics = [#tpu.dimension_semantics<parallel>, #tpu.dimension_semantics<arbitrary>], iteration_bounds = array<i64: 2, 2>, scalar_prefetch = 0 : i64, scratch_operands = 0 : i64, tpu.core_type = #tpu.core_type<tc>, window_params = [{transform_indices = @transform_0, window_bounds = array<i64: 1, 18, 18>}, {transform_indices = @transform_1, window_bounds = array<i64: 8>}, {transform_indices = @transform_2, window_bounds = array<i64: 8>}, {transform_indices = @transform_3, window_bounds = array<i64: 1, 8, 8, 16>}]} {
    %c8_i32 = arith.constant 8 : i32
    %0 = arith.muli %arg1, %c8_i32 : i32
    %1 = tpu.assume_multiple %0, 8 : i32
    %c0 = arith.constant 0 : index
    %2 = arith.index_cast %1 : i32 to index
    %c0_0 = arith.constant 0 : index
    %3 = vector.load %arg2[%c0, %2, %c0_0] : memref<1x18x18xf32, #tpu.memory_space<vmem>>, vector<1x10x18xf32>
    %4 = vector.shape_cast %3 : vector<1x10x18xf32> to vector<10x18xf32>
    %5 = vector.extract_strided_slice %4 {offsets = [0, 0], sizes = [8, 18], strides = [1, 1]} : vector<10x18xf32> to vector<8x18xf32>
    %6 = vector.extract_strided_slice %4 {offsets = [1, 0], sizes = [8, 18], strides = [1, 1]} : vector<10x18xf32> to vector<8x18xf32>
    %7 = arith.addf %5, %6 : vector<8x18xf32>
    %8 = vector.extract_strided_slice %4 {offsets = [2, 0], sizes = [8, 18], strides = [1, 1]} : vector<10x18xf32> to vector<8x18xf32>
    %9 = arith.addf %7, %8 : vector<8x18xf32>
    %10 = vector.extract_strided_slice %9 {offsets = [0, 0], sizes = [8, 16], strides = [1, 1]} : vector<8x18xf32> to vector<8x16xf32>
    %11 = vector.extract_strided_slice %9 {offsets = [0, 1], sizes = [8, 16], strides = [1, 1]} : vector<8x18xf32> to vector<8x16xf32>
    %12 = arith.addf %10, %11 : vector<8x16xf32>
    %13 = vector.extract_strided_slice %9 {offsets = [0, 2], sizes = [8, 16], strides = [1, 1]} : vector<8x18xf32> to vector<8x16xf32>
    %14 = arith.addf %12, %13 : vector<8x16xf32>
    %c0_i32 = arith.constant 0 : i32
    %15 = arith.index_cast %c0_i32 : i32 to index
    %16 = memref.load %arg3[%15] : memref<8xf32, #tpu.memory_space<smem>>
    %17 = vector.broadcast %16 : f32 to vector<8x16xf32>
    %18 = arith.mulf %14, %17 : vector<8x16xf32>
    %19 = arith.index_cast %c0_i32 : i32 to index
    %20 = memref.load %arg4[%19] : memref<8xf32, #tpu.memory_space<smem>>
    %21 = vector.broadcast %20 : f32 to vector<8x16xf32>
    %22 = arith.addf %18, %21 : vector<8x16xf32>
    %c0_1 = arith.constant 0 : index
    %23 = arith.index_cast %c0_i32 : i32 to index
    %c0_2 = arith.constant 0 : index
    %c0_3 = arith.constant 0 : index
    %24 = vector.load %arg5[%c0_1, %23, %c0_2, %c0_3] : memref<1x8x8x16xf32, #tpu.memory_space<vmem>>, vector<1x1x8x16xf32>
    %25 = vector.shape_cast %24 : vector<1x1x8x16xf32> to vector<8x16xf32>
    %26 = vector.shape_cast %22 : vector<8x16xf32> to vector<1x1x8x16xf32>
    tpu.vector_store %arg5[%c0_1, %23, %c0_2, %c0_3], %26 {strides = array<i32>} : memref<1x8x8x16xf32, #tpu.memory_space<vmem>>, vector<1x1x8x16xf32>,
    %c1_i32 = arith.constant 1 : i32
    %27 = arith.index_cast %c1_i32 : i32 to index
    %28 = memref.load %arg3[%27] : memref<8xf32, #tpu.memory_space<smem>>
    %29 = vector.broadcast %28 : f32 to vector<8x16xf32>
    %30 = arith.mulf %14, %29 : vector<8x16xf32>
    %31 = arith.index_cast %c1_i32 : i32 to index
    %32 = memref.load %arg4[%31] : memref<8xf32, #tpu.memory_space<smem>>
    %33 = vector.broadcast %32 : f32 to vector<8x16xf32>
    %34 = arith.addf %30, %33 : vector<8x16xf32>
    %c0_4 = arith.constant 0 : index
    %35 = arith.index_cast %c1_i32 : i32 to index
    %c0_5 = arith.constant 0 : index
    %c0_6 = arith.constant 0 : index
    %36 = vector.load %arg5[%c0_4, %35, %c0_5, %c0_6] : memref<1x8x8x16xf32, #tpu.memory_space<vmem>>, vector<1x1x8x16xf32>
    %37 = vector.shape_cast %36 : vector<1x1x8x16xf32> to vector<8x16xf32>
    %38 = vector.shape_cast %34 : vector<8x16xf32> to vector<1x1x8x16xf32>
    tpu.vector_store %arg5[%c0_4, %35, %c0_5, %c0_6], %38 {strides = array<i32>} : memref<1x8x8x16xf32, #tpu.memory_space<vmem>>, vector<1x1x8x16xf32>,
    %c2_i32 = arith.constant 2 : i32
    %39 = arith.index_cast %c2_i32 : i32 to index
    %40 = memref.load %arg3[%39] : memref<8xf32, #tpu.memory_space<smem>>
    %41 = vector.broadcast %40 : f32 to vector<8x16xf32>
    %42 = arith.mulf %14, %41 : vector<8x16xf32>
    %43 = arith.index_cast %c2_i32 : i32 to index
    %44 = memref.load %arg4[%43] : memref<8xf32, #tpu.memory_space<smem>>
    %45 = vector.broadcast %44 : f32 to vector<8x16xf32>
    %46 = arith.addf %42, %45 : vector<8x16xf32>
    %c0_7 = arith.constant 0 : index
    %47 = arith.index_cast %c2_i32 : i32 to index
    %c0_8 = arith.constant 0 : index
    %c0_9 = arith.constant 0 : index
    %48 = vector.load %arg5[%c0_7, %47, %c0_8, %c0_9] : memref<1x8x8x16xf32, #tpu.memory_space<vmem>>, vector<1x1x8x16xf32>
    %49 = vector.shape_cast %48 : vector<1x1x8x16xf32> to vector<8x16xf32>
    %50 = vector.shape_cast %46 : vector<8x16xf32> to vector<1x1x8x16xf32>
    tpu.vector_store %arg5[%c0_7, %47, %c0_8, %c0_9], %50 {strides = array<i32>} : memref<1x8x8x16xf32, #tpu.memory_space<vmem>>, vector<1x1x8x16xf32>,
    %c3_i32 = arith.constant 3 : i32
    %51 = arith.index_cast %c3_i32 : i32 to index
    %52 = memref.load %arg3[%51] : memref<8xf32, #tpu.memory_space<smem>>
    %53 = vector.broadcast %52 : f32 to vector<8x16xf32>
    %54 = arith.mulf %14, %53 : vector<8x16xf32>
    %55 = arith.index_cast %c3_i32 : i32 to index
    %56 = memref.load %arg4[%55] : memref<8xf32, #tpu.memory_space<smem>>
    %57 = vector.broadcast %56 : f32 to vector<8x16xf32>
    %58 = arith.addf %54, %57 : vector<8x16xf32>
    %c0_10 = arith.constant 0 : index
    %59 = arith.index_cast %c3_i32 : i32 to index
    %c0_11 = arith.constant 0 : index
    %c0_12 = arith.constant 0 : index
    %60 = vector.load %arg5[%c0_10, %59, %c0_11, %c0_12] : memref<1x8x8x16xf32, #tpu.memory_space<vmem>>, vector<1x1x8x16xf32>
    %61 = vector.shape_cast %60 : vector<1x1x8x16xf32> to vector<8x16xf32>
    %62 = vector.shape_cast %58 : vector<8x16xf32> to vector<1x1x8x16xf32>
    tpu.vector_store %arg5[%c0_10, %59, %c0_11, %c0_12], %62 {strides = array<i32>} : memref<1x8x8x16xf32, #tpu.memory_space<vmem>>, vector<1x1x8x16xf32>,
    %c4_i32 = arith.constant 4 : i32
    %63 = arith.index_cast %c4_i32 : i32 to index
    %64 = memref.load %arg3[%63] : memref<8xf32, #tpu.memory_space<smem>>
    %65 = vector.broadcast %64 : f32 to vector<8x16xf32>
    %66 = arith.mulf %14, %65 : vector<8x16xf32>
    %67 = arith.index_cast %c4_i32 : i32 to index
    %68 = memref.load %arg4[%67] : memref<8xf32, #tpu.memory_space<smem>>
    %69 = vector.broadcast %68 : f32 to vector<8x16xf32>
    %70 = arith.addf %66, %69 : vector<8x16xf32>
    %c0_13 = arith.constant 0 : index
    %71 = arith.index_cast %c4_i32 : i32 to index
    %c0_14 = arith.constant 0 : index
    %c0_15 = arith.constant 0 : index
    %72 = vector.load %arg5[%c0_13, %71, %c0_14, %c0_15] : memref<1x8x8x16xf32, #tpu.memory_space<vmem>>, vector<1x1x8x16xf32>
    %73 = vector.shape_cast %72 : vector<1x1x8x16xf32> to vector<8x16xf32>
    %74 = vector.shape_cast %70 : vector<8x16xf32> to vector<1x1x8x16xf32>
    tpu.vector_store %arg5[%c0_13, %71, %c0_14, %c0_15], %74 {strides = array<i32>} : memref<1x8x8x16xf32, #tpu.memory_space<vmem>>, vector<1x1x8x16xf32>,
    %c5_i32 = arith.constant 5 : i32
    %75 = arith.index_cast %c5_i32 : i32 to index
    %76 = memref.load %arg3[%75] : memref<8xf32, #tpu.memory_space<smem>>
    %77 = vector.broadcast %76 : f32 to vector<8x16xf32>
    %78 = arith.mulf %14, %77 : vector<8x16xf32>
    %79 = arith.index_cast %c5_i32 : i32 to index
    %80 = memref.load %arg4[%79] : memref<8xf32, #tpu.memory_space<smem>>
    %81 = vector.broadcast %80 : f32 to vector<8x16xf32>
    %82 = arith.addf %78, %81 : vector<8x16xf32>
    %c0_16 = arith.constant 0 : index
    %83 = arith.index_cast %c5_i32 : i32 to index
    %c0_17 = arith.constant 0 : index
    %c0_18 = arith.constant 0 : index
    %84 = vector.load %arg5[%c0_16, %83, %c0_17, %c0_18] : memref<1x8x8x16xf32, #tpu.memory_space<vmem>>, vector<1x1x8x16xf32>
    %85 = vector.shape_cast %84 : vector<1x1x8x16xf32> to vector<8x16xf32>
    %86 = vector.shape_cast %82 : vector<8x16xf32> to vector<1x1x8x16xf32>
    tpu.vector_store %arg5[%c0_16, %83, %c0_17, %c0_18], %86 {strides = array<i32>} : memref<1x8x8x16xf32, #tpu.memory_space<vmem>>, vector<1x1x8x16xf32>,
    %c6_i32 = arith.constant 6 : i32
    %87 = arith.index_cast %c6_i32 : i32 to index
    %88 = memref.load %arg3[%87] : memref<8xf32, #tpu.memory_space<smem>>
    %89 = vector.broadcast %88 : f32 to vector<8x16xf32>
    %90 = arith.mulf %14, %89 : vector<8x16xf32>
    %91 = arith.index_cast %c6_i32 : i32 to index
    %92 = memref.load %arg4[%91] : memref<8xf32, #tpu.memory_space<smem>>
    %93 = vector.broadcast %92 : f32 to vector<8x16xf32>
    %94 = arith.addf %90, %93 : vector<8x16xf32>
    %c0_19 = arith.constant 0 : index
    %95 = arith.index_cast %c6_i32 : i32 to index
    %c0_20 = arith.constant 0 : index
    %c0_21 = arith.constant 0 : index
    %96 = vector.load %arg5[%c0_19, %95, %c0_20, %c0_21] : memref<1x8x8x16xf32, #tpu.memory_space<vmem>>, vector<1x1x8x16xf32>
    %97 = vector.shape_cast %96 : vector<1x1x8x16xf32> to vector<8x16xf32>
    %98 = vector.shape_cast %94 : vector<8x16xf32> to vector<1x1x8x16xf32>
    tpu.vector_store %arg5[%c0_19, %95, %c0_20, %c0_21], %98 {strides = array<i32>} : memref<1x8x8x16xf32, #tpu.memory_space<vmem>>, vector<1x1x8x16xf32>,
    %c7_i32 = arith.constant 7 : i32
    %99 = arith.index_cast %c7_i32 : i32 to index
    %100 = memref.load %arg3[%99] : memref<8xf32, #tpu.memory_space<smem>>
    %101 = vector.broadcast %100 : f32 to vector<8x16xf32>
    %102 = arith.mulf %14, %101 : vector<8x16xf32>
    %103 = arith.index_cast %c7_i32 : i32 to index
    %104 = memref.load %arg4[%103] : memref<8xf32, #tpu.memory_space<smem>>
    %105 = vector.broadcast %104 : f32 to vector<8x16xf32>
    %106 = arith.addf %102, %105 : vector<8x16xf32>
    %c0_22 = arith.constant 0 : index
    %107 = arith.index_cast %c7_i32 : i32 to index
    %c0_23 = arith.constant 0 : index
    %c0_24 = arith.constant 0 : index
    %108 = vector.load %arg5[%c0_22, %107, %c0_23, %c0_24] : memref<1x8x8x16xf32, #tpu.memory_space<vmem>>, vector<1x1x8x16xf32>
    %109 = vector.shape_cast %108 : vector<1x1x8x16xf32> to vector<8x16xf32>
    %110 = vector.shape_cast %106 : vector<8x16xf32> to vector<1x1x8x16xf32>
    tpu.vector_store %arg5[%c0_22, %107, %c0_23, %c0_24], %110 {strides = array<i32>} : memref<1x8x8x16xf32, #tpu.memory_space<vmem>>, vector<1x1x8x16xf32>,
    %c8_i32_25 = arith.constant 8 : i32
    return
  }
  func.func @transform_0(%arg0: i32, %arg1: i32) -> (i32, i32, i32) {
    %c0_i32 = arith.constant 0 : i32
    %c0_i32_0 = arith.constant 0 : i32
    %c0_i32_1 = arith.constant 0 : i32
    return %arg0, %c0_i32, %c0_i32_0 : i32, i32, i32
  }
  func.func @transform_1(%arg0: i32, %arg1: i32) -> i32 {
    %c0_i32 = arith.constant 0 : i32
    %c0_i32_0 = arith.constant 0 : i32
    return %c0_i32 : i32
  }
  func.func @transform_2(%arg0: i32, %arg1: i32) -> i32 {
    %c0_i32 = arith.constant 0 : i32
    %c0_i32_0 = arith.constant 0 : i32
    return %c0_i32 : i32
  }
  func.func @transform_3(%arg0: i32, %arg1: i32) -> (i32, i32, i32, i32) {
    %c0_i32 = arith.constant 0 : i32
    %c0_i32_0 = arith.constant 0 : i32
    %c0_i32_1 = arith.constant 0 : i32
    return %arg0, %c0_i32, %arg1, %c0_i32_0 : i32, i32, i32, i32
  }
}

</mosaic_0001>

<bundles_post_ra>
// kernel: tpu_custom_call.1
= control target key start
LH: loop header
LB: loop body
LE: loop exit
PB: predicated region body
PF: predicated region fallthrough
CT: control target
= control target key end

     0   :  { %s926_s0 = inlined_call_operand.vmem [shape: f32[2,18,18], index: 0, kind: input, shape index: {}]   ;;  %s927_s1 = inlined_call_operand.vmem [shape: f32[8], index: 1, kind: input, shape index: {}]   ;;  %s928_s2 = inlined_call_operand.vmem [shape: f32[8], index: 2, kind: input, shape index: {}]   ;;  %s929_s3 = inlined_call_operand.hbm [shape: f32[2,8,16,16], index: 3, kind: output, shape index: {}]  }
   0x1   :  { %932 = sst [smem:[#allocation13_spill]] %s926_s0 }
   0x2   :  { %933 = sst [smem:[#allocation14_spill]] %s927_s1 }
   0x3   :  { %934 = sst [smem:[#allocation15_spill]] %s928_s2 }
   0x4   :  { %8 = vsyncpa [#allocation4], 0 }
   0x5   :  { %9 = vsyncpa [#allocation6], 0 }
   0x6   :  { %10 = vsyncpa [#allocation3], 0 }
   0x7   :  { %12 = vsyncpa [#allocation3 + $0x1], 0  ;;  %s714_s12 = smov 0   ;;  %s716_s13 = smov 0  }
   0x8   :  { %s718_s14 = smov 0   ;;  %s720_s15 = smov 0  }
   0x9   :  { %s722_s16 = smov 0   ;;  %s724_s17 = smov 0  }
   0xa   :  { %s726_s18 = smov 0   ;;  %s728_s19 = smov 0  }
   0xb LB: > { %s417_s20 = sadd.s32 4294967295, %s685_s19   ;;  %s418_s21 = sadd.s32 4294967294, %s685_s19   ;;  %s685_s19 = sphi %s728_s19, %s18_s19   ;;  %s681_s18 = sphi %s726_s18, %s952_s18   ;;  %s677_s17 = sphi %s724_s17, %s951_s17   ;;  %s673_s16 = sphi %s722_s16, %s950_s16   ;;  %s669_s15 = sphi %s720_s15, %s949_s15   ;;  %s665_s14 = sphi %s718_s14, %s948_s14   ;;  %s661_s13 = sphi %s716_s13, %s947_s13   ;;  %s657_s12 = sphi %s714_s12, %s946_s12  }
   0xc   : > { %s27_s22 = sadd.s32 1, %s677_s17  ;;  %s30_s23 = sadd.s32 1, %s681_s18 }
   0xd   : > { %p28_p0 = scmp.ge.s32.totalorder %s27_s22, 2  ;;  %s107_s24 = sadd.s32 1, %s665_s14 }
   0xe   : > { %p117_p1 = scmp.ne.s32.totalorder %s665_s14, %s661_s13  ;;  %p118_p2 = scmp.eq.s32.totalorder %s417_s20, 3 }
   0xf   : > { %s954_s22 = smov (%p28_p0, %s27_s22), 0  ;;  %s956_s23 = smov (!%p28_p0, %s30_s23), %s681_s18 }
  0x10   : > { %935 = sst [smem:[#allocation11_spill]] %s954_s22  ;;  %s103_s25 = ssub.s32 %s677_s17, %s954_s22 }
  0x11   : > { %p766_p3 = por %p118_p2, %p117_p1  ;;  %p32_p4 = scmp.ge.s32.totalorder %s956_s23, 2 }
  0x12   : > { %p123_p5 = scmp.ne.s32.totalorder %s661_s13, %s657_s12  ;;  %p124_p6 = scmp.eq.s32.totalorder %s418_s21, 3 }
  0x13   : > { %p419_p7 = scmp.ge.s32.totalorder %s685_s19, 1  ;;  %s958_s23 = smov (%p32_p4, %s956_s23), 0 }
  0x14   : > { %937 = sst [smem:[#allocation12_spill]] %s958_s23  ;;  %p775_p8 = por %p124_p6, %p123_p5 }
  0x15   : > { %p131_p9 = scmp.lt.s32.totalorder %s685_s19, 5  ;;  %s102_s28 = ssub.s32 %s681_s18, %s958_s23 }
  0x16   : > { %s104_s29 = sor.u32 %s103_s25, %s102_s28  ;;  %p786_p12 = scmp.eq.s32.totalorder %s417_s20, 0 }
  0x17   : > { %p782_p10 = pnand %p419_p7, %p131_p9  ;;  %p105_p11 = scmp.eq.s32.totalorder %s104_s29, 0 }
  0x18   : > { %s941_s1 = sld [smem:[#allocation14_spill]]  ;;  %s687_s20 = smov [#allocation2]  }
  0x19   : > { %p466_p13 = pneg %p782_p10  ;;  %s942_s2 = sld [smem:[#allocation15_spill]] }
  0x1a   : > { %s796_s8 = scalar_select %p105_p11, %s665_s14, %s107_s24  }
  0x1b   : > { %p467_p0 = pnand %p786_p12, %p466_p13  ;;  %s688_s21 = smov [#allocation5]  }
  0x1d   : > { %174 = sbr.rel (%p782_p10) target bundleno = 197 (0xc5), region = 32 }
  0x1e   : > { %s143_s7 = sshll.u32 %s941_s1, 4  ;;  %s144_s7 = int_to_ptr.vmem [resolvable:$true] %s143_s7 }
  0x1f   : > { %s153_s11 = sshll.u32 %s942_s2, 4  ;;  %s154_s11 = int_to_ptr.vmem [resolvable:$true] %s153_s11 }
  0x20   : > { %469 = dma.vmem_to_smem (!%p467_p0), %s144_s7, 16, %s687_s20, [#allocation4]  }
  0x21   : > { %472 = dma.vmem_to_smem (!%p467_p0), %s154_s11, 16, %s688_s21, [#allocation6]  }
  0x22   : > { %644 = dma.done.wait (%p786_p12), [#allocation4], 16  }
  0x23   : > { %646 = vsyncadd (%p786_p12), [#allocation4], 4294967280 }
  0x24   : > { %648 = dma.done.wait (%p786_p12), [#allocation6], 16  }
  0x25   : > { %650 = vsyncadd (%p786_p12), [#allocation6], 4294967280 }
  0x26   : > { %186 = sfence }
  0x27   : > { %p205_p1 = scmp.lt.s32.totalorder %s673_s16, 1  ;;  %s428_s28 = sshll.u32 %s669_s15, 3  ;;  %vm216_vm0 = vcmask 1046528   ;;  %vm222_vm1 = vcmask 1045504   ;;  %vm243_vm2 = vcmask 130048  }
  0x28   : > { %s943_s0 = sld [smem:[#allocation13_spill]]  ;;  %s689_s4 = smov 127  }
  0x29   : > { %s206_s24 = scalar_select %p205_p1, %s673_s16, 1 }
  0x2a   : > { %s690_s7 = smov 126   ;;  %s819_s9 = sld [smem:[#allocation2]] }
  0x2b   : > { %s455_s25 = smul.u32 24, %s206_s24  ;;  %s821_s10 = sld [smem:[#allocation5]] }
  0x2c   : > { %s823_s11 = sld [smem:[#allocation2 + $0x1]]  ;;  %s202_s2 = sand.u32 1, %s661_s13  }
  0x2d   : > { %s825_s20 = sld [smem:[#allocation5 + $0x1]] }
  0x2e   : > { %s209_s5 = scalar_lea.vmem %s943_s0, %s455_s25  ;;  %s827_s21 = sld [smem:[#allocation2 + $0x2]] }
  0x2f   : > { %s211_s6 = scalar_lea.vmem %s209_s5, %s428_s28  ;;  %s829_s24 = sld [smem:[#allocation5 + $0x2]] }
  0x30   : > { %v212_v0 = vld [vmem:[%s211_s6] sm:$0xff]  ;;  %v213_v1 = vld [vmem:[%s211_s6 + $0x8] sm:$0x3]  ;;  %s831_s25 = sld [smem:[#allocation2 + $0x3]]  ;;  %s451_s0 = sshll.u32 %s673_s16, 4  ;;  %v238_v12 = vstv %s819_s9 }
  0x31   : > { %v217_v2 = vrot.slane %v212_v0, 1  ;;  %v218_v3 = vrot.slane %v213_v1, 1  ;;  %v223_v4 = vrot.slane %v212_v0, 2  ;;  %v224_v5 = vrot.slane %v213_v1, 2  ;;  %s833_s28 = sld [smem:[#allocation5 + $0x3]]  ;;  %s856_s22 = sadd.s32 %s669_s15, %s451_s0 }
  0x32   : > { %s835_s29 = sld [smem:[#allocation2 + $0x4]]  ;;  %v241_v13 = vstv %s821_s10  ;;  %v246_v14 = vstv %s823_s11  ;;  %s426_s16 = sshll.u32 %s202_s2, 6 }
  0x33   : > { %v219_v6 = vsel %vm216_vm0, %v217_v2, %v218_v3  ;;  %v225_v7 = vsel %vm222_vm1, %v223_v4, %v224_v5  ;;  %s837_s30 = sld [smem:[#allocation2 + $0x5]]  ;;  %v249_v18 = vstv %s825_s20  ;;  %s452_s0 = sshll.u32 %s856_s22, 3 }
  0x34   : > { %v221_v8 = vadd.f32 %v219_v6, %v212_v0  ;;  %s839_s5 = sld [smem:[#allocation2 + $0x6]]  ;;  %v254_v15 = vstv %s827_s21  ;;  %s314_s10 = scalar_lea.hbm %s929_s3, %s452_s0 }
  0x35   : > { %s841_s6 = sld [smem:[#allocation2 + $0x7]]  ;;  %v257_v22 = vstv %s829_s24  ;;  %s204_s22 = scalar_lea.vmem [#allocation7], %s426_s16 }
  0x36   : > { %v227_v9 = vadd.f32 %v225_v7, %v221_v8  ;;  %s848_s1 = sld [smem:[#allocation5 + $0x6]]  ;;  %v262_v16 = vstv %s831_s25  ;;  %s315_s11 = sshll.u32 %s204_s22, 4  ;;  %s316_s11 = int_to_ptr.vmem [resolvable:$true] %s315_s11 }
  0x37   : > { %s853_s23 = sld [smem:[#allocation5 + $0x7]]  ;;  %v265_v23 = vstv %s833_s28  ;;  %s317_s20 = sshll.u32 %s314_s10, 4  ;;  %s318_s20 = int_to_ptr.hbm [resolvable:$true] %s317_s20 }
  0x38   : > { %229 = vrot.lane.b32.xlu0 %v227_v9, %s689_s4  ;;  %s843_s4 = sld [smem:[#allocation5 + $0x4]]  ;;  %v270_v19 = vstv %s835_s29  ;;  %s603_s28 = scalar_lea.hbm %s929_s3, 256 }
  0x39   : > { %v278_v20 = vstv %s837_s30 }
  0x3a   : > { %v286_v24 = vstv %s839_s5 }
  0x3b   : > { %v294_v25 = vstv %s841_s6 }
  0x3c   : > { %v289_v38 = vstv %s848_s1  ;;  %s302_s1 = scalar_lea.sflag [#allocation3], %s202_s2 }
  0x3d   : > { %v297_v41 = vstv %s853_s23  ;;  %s597_s23 = sshra.s32 %s318_s20, 4  ;;  %s598_s23 = int_to_ptr.hbm [resolvable:$true] %s597_s23 }
  0x3e   : > { %v273_v30 = vstv %s843_s4  ;;  %s599_s21 = scalar_lea.hbm %s598_s23, 64  ;;  %p604_p6 = scmp.lt.s32.totalorder %s598_s23, %s929_s3 }
  0x3f   : > { %p600_p2 = scmp.ne.s32.totalorder %s598_s23, %s599_s21  ;;  %p605_p7 = scmp.lt.s32.totalorder %s603_s28, %s599_s21 }
  0x40   : > { %233 = vrot.lane.b32.xlu0 %v227_v9, %s690_s7  ;;  %s845_s7 = sld [smem:[#allocation5 + $0x5]] }
  0x41   : > { %p601_p4 = pnand %p600_p2, %p766_p3  ;;  %p606_p9 = por %p605_p7, %p604_p6 }
  0x43   : > { %p602_p5 = pneg %p601_p4 }
  0x45   : > { %p607_p10 = pnand %p606_p9, %p602_p5 }
  0x46   : > { %v281_v31 = vstv %s845_s7 }
  0xaa   : > { %v230_v10 = vpop.permute.xlu0 %229 }
  0xab   : > { %v232_v11 = vadd.f32 %v230_v10, %v227_v9 }
  0xb2   : > { %v234_v17 = vpop.permute.xlu0 %233 }
  0xb3   : > { %v236_v21 = vadd.f32 %v234_v17, %v232_v11 }
  0xb5   : > { %v239_v26 = vmul.f32 %v238_v12, %v236_v21  ;;  %v247_v27 = vmul.f32 %v246_v14, %v236_v21  ;;  %v255_v28 = vmul.f32 %v254_v15, %v236_v21  ;;  %v263_v29 = vmul.f32 %v262_v16, %v236_v21 }
  0xb6   : > { %v271_v32 = vmul.f32 %v270_v19, %v236_v21  ;;  %v279_v33 = vmul.f32 %v278_v20, %v236_v21  ;;  %v287_v37 = vmul.f32 %v286_v24, %v236_v21  ;;  %v295_v40 = vmul.f32 %v294_v25, %v236_v21 }
  0xb7   : > { %v242_v34 = vadd.f32 %v241_v13, %v239_v26  ;;  %v250_v35 = vadd.f32 %v249_v18, %v247_v27  ;;  %v258_v36 = vadd.f32 %v257_v22, %v255_v28  ;;  %v266_v39 = vadd.f32 %v265_v23, %v263_v29 }
  0xb8   : > { %v274_v42 = vadd.f32 %v273_v30, %v271_v32  ;;  %v282_v43 = vadd.f32 %v281_v31, %v279_v33  ;;  %v290_v44 = vadd.f32 %v289_v38, %v287_v37  ;;  %v298_v45 = vadd.f32 %v297_v41, %v295_v40 }
  0xb9   : > { %244 = vst.msk [vmem:[%s204_s22] sm:$0xff] %vm243_vm2, %v242_v34 }
  0xba   : > { %431 = vst.msk [vmem:[%s204_s22 + $0x8] sm:$0xff] %vm243_vm2, %v250_v35 }
  0xbb   : > { %434 = vst.msk [vmem:[%s204_s22 + $0x10] sm:$0xff] %vm243_vm2, %v258_v36 }
  0xbc   : > { %437 = vst.msk [vmem:[%s204_s22 + $0x18] sm:$0xff] %vm243_vm2, %v266_v39 }
  0xbd   : > { %440 = vst.msk [vmem:[%s204_s22 + $0x20] sm:$0xff] %vm243_vm2, %v274_v42 }
  0xbe   : > { %443 = vst.msk [vmem:[%s204_s22 + $0x28] sm:$0xff] %vm243_vm2, %v282_v43 }
  0xbf   : > { %446 = vst.msk [vmem:[%s204_s22 + $0x30] sm:$0xff] %vm243_vm2, %v290_v44 }
  0xc0   : > { %449 = vst.msk [vmem:[%s204_s22 + $0x38] sm:$0xff] %vm243_vm2, %v298_v45 }
  0xc1   : > { %610 = shalt.err (!%p607_p10)
}
  0xc2   : > { %s691_s2 = smov 128   ;;  %s692_s5 = smov 256  }
  0xc3   : > { %s693_s6 = smov 8  }
  0xc4   : > { %464 = dma.vmem_to_hbm [thread:$0]  (%p766_p3), %s316_s11, 1024, %s318_s20, %s302_s1, %s691_s2, %s692_s5, %s693_s6  }
  0xc5 PF: > { %p481_p11 = scmp.ge.s32.totalorder %s685_s19, 2  ;;  %s332_s4 = sand.u32 1, %s657_s12  }
  0xc6   : > { %s333_s7 = scalar_lea.sflag [#allocation3], %s332_s4 }
  0xc7   : > { %p474_p12 = pnand %p481_p11, %p775_p8 }
  0xc9   : > { %p475_p13 = pneg %p474_p12 }
  0xcb   : > { %652 = dma.done.wait (%p475_p13), %s333_s7, 1024  }
  0xcc   : > { %654 = vsyncadd (%p475_p13), %s333_s7, 4294966272  ;;  %s18_s19 = sadd.s32 1, %s685_s19   ;;  %s944_s26 = sld [smem:[#allocation11_spill]] }
  0xcd   : > { %p15_p0 = scmp.ge.s32.totalorder %s18_s19, 6   ;;  %s945_s0 = sld [smem:[#allocation12_spill]] }
  0xce   : > { %s946_s12 = smov %s661_s13  ;;  %s947_s13 = smov %s665_s14 }
  0xcf   : > { %s948_s14 = smov %s796_s8  ;;  %s949_s15 = smov %s677_s17 }
  0xd0   : > { %s950_s16 = smov %s681_s18  ;;  %17 = sbr.rel (!%p15_p0) target bundleno = 11 (0xb), region = 84 }
  0xd2   : > { %s951_s17 = smov %s944_s26 }
  0xd3   : > { %s952_s18 = smov %s945_s0 }
  0xd5   :  { %339 = vsyncpa [#allocation3], 1 }
  0xd6   :  { %341 = vsyncpa [#allocation3 + $0x1], 1 }
  0xd7   :  { %342 = vsyncpa [#allocation4], 1 }
  0xd8   :  { %344 = vsyncpa [#allocation4 + $0x1], 1 }
  0xd9   :  { %345 = vsyncpa [#allocation6], 1 }

</bundles_post_ra>
